<compile_context>
chip_gen: v6e
topology: v6e:2x2x1
jax: 0.10.0
libtpu: 0.0.40
codegen_flags: <defaults>
</compile_context>

<pallas_src>
import jax
import jax.numpy as jnp
from jax.experimental import pallas as pl
from jax.experimental.pallas import tpu as pltpu


# Sum of the scalar constants subtracted on the v7 path:
#   260.39 + 1 + 0.5 + 228 - 0.54 + 0.9 - 0.377 = 489.873
# (Pre-summing changes rounding by ~1e-4 at |v7|~490 vs. the op-by-op chain;
#  well within the 1e-3 tolerance used below.)
_CONST_SUM = 260.39 + 1.0 + 0.5 + 228.0 + (-0.54) + 0.9 + (-0.377)


# ----------------------------- Pallas kernel ------------------------------ #
def conv_sub_kernel(w_ref, p_ref, o_ref):
    # w_ref : (OC, K+1)     f32   conv weights with folded bias column
    # p_ref : (K+1, M)      f32   im2col patches + ones row, spatial on lanes
    # o_ref : (OC, M)       f32   v7, NCHW-flat
    o_ref[...] = jnp.dot(w_ref[...], p_ref[...],
                         preferred_element_type=jnp.float32)


# ------------------------------ JAX wrapper -------------------------------- #
def model_forward(x_nchw, weight, bias):
    """x_nchw: (N, 3, H, W) f32; weight: (16, 3, 4, 4) f32; bias: (16,) f32."""
    n, c, h, w = x_nchw.shape
    oc, ic, kh, kw = weight.shape
    assert c == ic
    ho, wo = h - kh + 1, w - kw + 1
    k = ic * kh * kw
    m = n * ho * wo

    # im2col in one XLA op; output (N, C*KH*KW, HO, WO) with feature index
    # ordered as c*(KH*KW) + i*KW + j  (matches weight.reshape(OC, K)).
    patches = jax.lax.conv_general_dilated_patches(
        x_nchw, filter_shape=(kh, kw), window_strides=(1, 1),
        padding="VALID", dimension_numbers=("NCHW", "OIHW", "NCHW"))
    # For N == 1 this moveaxis/reshape is a bitcast (no HBM transpose).
    patches = jnp.moveaxis(patches, 1, 0).reshape(k, m)            # (K, M)
    # Fold bias+constants into the GEMM: ones row against a bias column.
    patches_aug = jnp.concatenate(
        [patches, jnp.ones((1, m), dtype=jnp.float32)], axis=0)    # (K+1, M)

    w_mat = weight.reshape(oc, k)                                  # (OC, K)
    b_adj = (bias - jnp.float32(_CONST_SUM)).reshape(oc, 1)        # (OC, 1)
    w_aug = jnp.concatenate([w_mat, b_adj], axis=1)                # (OC, K+1)

    cost = pl.CostEstimate(
        flops=2 * oc * (k + 1) * m,
        transcendentals=0,
        bytes_accessed=(oc * (k + 1) + (k + 1) * m + oc * m) * 4,
    )

    out_flat = pl.pallas_call(
        conv_sub_kernel,
        out_shape=jax.ShapeDtypeStruct((oc, m), jnp.float32),
        # Full-array VMEM blocks, no grid: nothing to pipeline at this size.
        in_specs=[
            pl.BlockSpec(memory_space=pltpu.MemorySpace.VMEM),
            pl.BlockSpec(memory_space=pltpu.MemorySpace.VMEM),
        ],
        out_specs=pl.BlockSpec(memory_space=pltpu.MemorySpace.VMEM),
        compiler_params=pltpu.CompilerParams(
            allow_input_fusion=[True, True]),
        cost_estimate=cost,
    )(w_aug, patches_aug)

    out = out_flat.reshape(oc, n, ho, wo)                          # (OC, N, HO, WO)
    return jnp.moveaxis(out, 1, 0)                                 # (N, OC, HO, WO)


# ------------------------------ reference ---------------------------------- #
def model_forward_ref(x_nchw, weight, bias):
    v1 = jax.lax.conv_general_dilated(
        x_nchw, weight, window_strides=(1, 1), padding="VALID",
        dimension_numbers=("NCHW", "OIHW", "NCHW"))
    v1 = v1 + bias.reshape(1, -1, 1, 1)
    v7 = (((((((v1 - 260.39) - 1.0) - 0.5) - 228.0)
            - (-0.54)) - 0.9) - (-0.377))
    return v7


if __name__ == "__main__":
    key = jax.random.PRNGKey(0)
    kx, kw_, kb = jax.random.split(key, 3)

    # deterministic inputs / parameters (shapes from the torch module)
    x = jax.random.normal(kx, (1, 3, 32, 32), dtype=jnp.float32)
    fan_in = 3 * 4 * 4
    bound = 1.0 / (fan_in ** 0.5)
    weight = jax.random.uniform(kw_, (16, 3, 4, 4), dtype=jnp.float32,
                                minval=-bound, maxval=bound)
    bias = jax.random.uniform(kb, (16,), dtype=jnp.float32,
                              minval=-bound, maxval=bound)

    out = jax.block_until_ready(model_forward(x, weight, bias))
    ref = jax.block_until_ready(model_forward_ref(x, weight, bias))

    assert out.shape == (1, 16, 29, 29), out.shape
    assert jnp.allclose(out, ref, atol=1e-3, rtol=1e-3), (
        float(jnp.max(jnp.abs(out - ref))))
    print("KERNEL_OK")
</pallas_src>

<mosaic_0001>
module attributes {stable_mosaic.version = 11 : i64} {
  func.func @conv_sub_kernel(%arg0: memref<16x49xf32, #tpu.memory_space<vmem>>, %arg1: memref<49x841xf32, #tpu.memory_space<vmem>>, %arg2: memref<16x841xf32, #tpu.memory_space<vmem>>) attributes {dimension_semantics = [], scalar_prefetch = 0 : i64, scratch_operands = 0 : i64, tpu.core_type = #tpu.core_type<tc>} {
    %c0 = arith.constant 0 : index
    %c0_0 = arith.constant 0 : index
    %0 = vector.load %arg0[%c0, %c0_0] : memref<16x49xf32, #tpu.memory_space<vmem>>, vector<16x49xf32>
    %c0_1 = arith.constant 0 : index
    %c0_2 = arith.constant 0 : index
    %1 = vector.load %arg1[%c0_1, %c0_2] : memref<49x841xf32, #tpu.memory_space<vmem>>, vector<49x841xf32>
    %cst = arith.constant dense<0.000000e+00> : vector<16x841xf32>
    %2 = tpu.matmul %0, %1, %cst {dimension_numbers = #tpu.dot_dimension_numbers<[1], [0], [0], [1], [0, 0, 1, 1], [], []>} : vector<16x49xf32>, vector<49x841xf32>, vector<16x841xf32> -> vector<16x841xf32>
    %c0_3 = arith.constant 0 : index
    %c0_4 = arith.constant 0 : index
    %3 = vector.load %arg2[%c0_3, %c0_4] : memref<16x841xf32, #tpu.memory_space<vmem>>, vector<16x841xf32>
    tpu.vector_store %arg2[%c0_3, %c0_4], %2 {strides = array<i32>} : memref<16x841xf32, #tpu.memory_space<vmem>>, vector<16x841xf32>,
    return
  }
}

</mosaic_0001>

<bundles_post_ra>
// kernel: tpu_custom_call.1
= control target key start
LH: loop header
LB: loop body
LE: loop exit
PB: predicated region body
PF: predicated region fallthrough
CT: control target
= control target key end

     0   :  { %7 = vsyncpa [#allocation3], 0  ;;  %s640_s0 = inlined_call_operand.hbm [shape: f32[16,49], index: 0, kind: input, shape index: {}]   ;;  %s641_s1 = inlined_call_operand.hbm [shape: f32[49,841], index: 1, kind: input, shape index: {}]   ;;  %s642_s2 = inlined_call_operand.hbm [shape: f32[16,841], index: 2, kind: output, shape index: {}]  }
   0x1   :  { %8 = vsyncpa [#allocation6], 0 }
   0x2   :  { %9 = vsyncpa [#allocation4], 0  ;;  %s574_s9 = smov [#allocation2]  }
   0x3   :  { %s15_s10 = sshll.u32 %s574_s9, 4  ;;  %s16_s10 = int_to_ptr.vmem [resolvable:$true] %s15_s10 }
   0x4   :  { %s516_s11 = scalar_lea.vmem %s16_s10, 256  ;;  %p521_p1 = scmp.lt.s32.totalorder %s16_s10, %s16_s10 }
   0x5   :  { %p517_p0 = scmp.ne.s32.totalorder %s16_s10, %s516_s11  ;;  %p522_p2 = scmp.lt.s32.totalorder %s516_s11, %s516_s11 }
   0x7   :  { %p523_p3 = por %p522_p2, %p521_p1 }
   0x9   :  { %p524_p4 = pnand %p523_p3, %p517_p0 }
   0xb   :  { %527 = shalt.err (!%p524_p4)
}
   0xc   :  { %s575_s12 = smov 128   ;;  %s576_s13 = smov 8  }
   0xd   :  { %21 = dma.hbm_to_vmem [thread:$0]  %s640_s0, 256, %s16_s10, [#allocation3], %s575_s12, %s575_s12, %s576_s13  }
   0xe   :  { %s577_s16 = smov [#allocation5]  }
   0xf   :  { %s27_s17 = sshll.u32 %s577_s16, 4  ;;  %s28_s17 = int_to_ptr.vmem [resolvable:$true] %s27_s17 }
  0x10   :  { %s536_s18 = scalar_lea.vmem %s28_s17, 6272  ;;  %p541_p6 = scmp.lt.s32.totalorder %s28_s17, %s28_s17 }
  0x11   :  { %p537_p5 = scmp.ne.s32.totalorder %s28_s17, %s536_s18  ;;  %p542_p7 = scmp.lt.s32.totalorder %s536_s18, %s536_s18 }
  0x13   :  { %p543_p8 = por %p542_p7, %p541_p6 }
  0x15   :  { %p544_p9 = pnand %p543_p8, %p537_p5 }
  0x17   :  { %547 = shalt.err (!%p544_p9)
}
  0x18   :  { %s578_s19 = smov 896   ;;  %s579_s20 = smov 56  }
  0x19   :  { %33 = dma.hbm_to_vmem [thread:$0]  %s641_s1, 6272, %s28_s17, [#allocation6], %s578_s19, %s578_s19, %s579_s20  }
  0x1a   :  { %568 = dma.done.wait [#allocation3], 256  }
  0x1b   :  { %569 = vsyncadd [#allocation3], 4294967040 }
  0x1c   :  { %570 = dma.done.wait [#allocation6], 6272  }
  0x1d   :  { %571 = vsyncadd [#allocation6], 4294961024  ;;  %v580_v0 = vmov 0.0   ;;  %vm98_vm0 = vcmask 1040384   ;;  %v85_v1 = vld [vmem:[#allocation5 + $0x158] sm:$0x1] }
  0x1e   :  { %184 = vmatprep.mubr.f32.mxu0 %v580_v0  ;;  %261 = vmatprep.mubr.f32.mxu1 %v580_v0  ;;  %v84_v2 = vld [vmem:[#allocation5 + $0x150] sm:$0x1]  ;;  %v78_v3 = vld [vmem:[#allocation5 + $0x120] sm:$0xff]  ;;  %v87_v4 = vld [vmem:[#allocation5 + $0x168] sm:$0x1]  ;;  %vm91_vm1 = vcmask 400384  }
  0x1f   :  { %459 = vmatprep.subr.msk.mxu0 %vm98_vm0, %v85_v1  ;;  %v77_v5 = vld [vmem:[#allocation5 + $0x118] sm:$0xff]  ;;  %v86_v6 = vld [vmem:[#allocation5 + $0x160] sm:$0x1]  ;;  %463 = vmatprep.subr.msk.mxu1 %vm98_vm0, %v87_v4  ;;  %v71_v7 = vld [vmem:[#allocation5 + $0xe8] sm:$0xff]  ;;  %vm432_vm2 = vcmask 596992   ;;  %s581_s0 = smov [#allocation7]  }
  0x20   :  { %460 = vmatpush1.msk.msra.mxu0 %vm98_vm0, %v84_v2  ;;  %v80_v8 = vld [vmem:[#allocation5 + $0x130] sm:$0xff]  ;;  %464 = vmatpush1.msk.msra.mxu1 %vm98_vm0, %v86_v6  ;;  %v70_v9 = vld [vmem:[#allocation5 + $0xe0] sm:$0xff]  ;;  %v79_v10 = vld [vmem:[#allocation5 + $0x128] sm:$0xff]  ;;  %s446_s1 = sshll.u32 %s581_s0, 4  ;;  %s447_s1 = int_to_ptr.vmem [resolvable:$true] %s446_s1 }
  0x21   :  { %140 = vmatprep.subr.mxu0 %v78_v3  ;;  %v73_v11 = vld [vmem:[#allocation5 + $0xf8] sm:$0xff]  ;;  %217 = vmatprep.subr.mxu1 %v80_v8  ;;  %v64_v12 = vld [vmem:[#allocation5 + $0xb0] sm:$0xff]  ;;  %v63_v14 = vld [vmem:[#allocation5 + $0xa8] sm:$0xff]  ;;  %s548_s23 = scalar_lea.vmem %s447_s1, 1792  ;;  %p553_p11 = scmp.lt.s32.totalorder %s447_s1, %s447_s1 }
  0x22   :  { %141 = vmatpush1.msra.mxu0 %v77_v5  ;;  %v72_v13 = vld [vmem:[#allocation5 + $0xf0] sm:$0xff]  ;;  %218 = vmatpush1.msra.mxu1 %v79_v10  ;;  %v66_v15 = vld [vmem:[#allocation5 + $0xc0] sm:$0xff]  ;;  %v57_v16 = vld [vmem:[#allocation5 + $0x78] sm:$0xff]  ;;  %p549_p10 = scmp.ne.s32.totalorder %s447_s1, %s548_s23  ;;  %p554_p12 = scmp.lt.s32.totalorder %s548_s23, %s548_s23 }
  0x23   :  { %142 = vmatprep.subr.mxu0 %v71_v7  ;;  %219 = vmatprep.subr.mxu1 %v73_v11  ;;  %v65_v17 = vld [vmem:[#allocation5 + $0xb8] sm:$0xff]  ;;  %v56_v18 = vld [vmem:[#allocation5 + $0x70] sm:$0xff]  ;;  %v59_v19 = vld [vmem:[#allocation5 + $0x88] sm:$0xff] }
  0x24   :  { %143 = vmatpush1.msra.mxu0 %v70_v9  ;;  %220 = vmatpush1.msra.mxu1 %v72_v13  ;;  %v50_v20 = vld [vmem:[#allocation5 + $0x40] sm:$0xff]  ;;  %v49_v22 = vld [vmem:[#allocation5 + $0x38] sm:$0xff]  ;;  %v52_v23 = vld [vmem:[#allocation5 + $0x50] sm:$0xff]  ;;  %p555_p13 = por %p554_p12, %p553_p11 }
  0x25   :  { %144 = vmatprep.subr.mxu0 %v64_v12  ;;  %221 = vmatprep.subr.mxu1 %v66_v15  ;;  %v58_v21 = vld [vmem:[#allocation5 + $0x80] sm:$0xff]  ;;  %v43_v24 = vld [vmem:[#allocation5 + $0x8] sm:$0xff]  ;;  %v45_v27 = vld [vmem:[#allocation5 + $0x18] sm:$0xff] }
  0x26   :  { %145 = vmatpush1.msra.mxu0 %v63_v14  ;;  %222 = vmatpush1.msra.mxu1 %v65_v17  ;;  %v51_v25 = vld [vmem:[#allocation5 + $0x48] sm:$0xff]  ;;  %v42_v26 = vld [vmem:[#allocation5] sm:$0xff]  ;;  %v612_v28 = vld [vmem:[#allocation2] sm:$0xff]  ;;  %p556_p0 = pnand %p555_p13, %p549_p10 }
  0x27   :  { %146 = vmatprep.subr.mxu0 %v57_v16  ;;  %223 = vmatprep.subr.mxu1 %v59_v19  ;;  %v89_v29 = vld [vmem:[#allocation5 + $0x178] sm:$0x1]  ;;  %v44_v30 = vld [vmem:[#allocation5 + $0x10] sm:$0xff]  ;;  %v82_v32 = vld [vmem:[#allocation5 + $0x140] sm:$0xff] }
  0x28   :  { %147 = vmatpush1.msra.mxu0 %v56_v18  ;;  %224 = vmatpush1.msra.mxu1 %v58_v21  ;;  %v88_v31 = vld [vmem:[#allocation5 + $0x170] sm:$0x1]  ;;  %v90_v33 = vld [vmem:[#allocation5 + $0x180] sm:$0x1]  ;;  %v81_v34 = vld [vmem:[#allocation5 + $0x138] sm:$0xff] }
  0x29   :  { %148 = vmatprep.subr.mxu0 %v50_v20  ;;  %225 = vmatprep.subr.mxu1 %v52_v23  ;;  %v75_v35 = vld [vmem:[#allocation5 + $0x108] sm:$0xff]  ;;  %v74_v37 = vld [vmem:[#allocation5 + $0x100] sm:$0xff]  ;;  %v68_v38 = vld [vmem:[#allocation5 + $0xd0] sm:$0xff] }
  0x2a   :  { %149 = vmatpush1.msra.mxu0 %v49_v22  ;;  %226 = vmatpush1.msra.mxu1 %v51_v25  ;;  %v83_v36 = vld [vmem:[#allocation5 + $0x148] sm:$0xff]  ;;  %v76_v39 = vld [vmem:[#allocation5 + $0x110] sm:$0xff]  ;;  %v41_v41 = vld [vmem:[#allocation2 + $0x8] sm:$0xff] }
  0x2b   :  { %150 = vmatprep.subr.mxu0 %v43_v24  ;;  %227 = vmatprep.subr.mxu1 %v45_v27  ;;  %v67_v40 = vld [vmem:[#allocation5 + $0xc8] sm:$0xff]  ;;  %v61_v42 = vld [vmem:[#allocation5 + $0x98] sm:$0xff]  ;;  %v60_v44 = vld [vmem:[#allocation5 + $0x90] sm:$0xff] }
  0x2c   :  { %151 = vmatpush1.msra.mxu0 %v42_v26  ;;  %228 = vmatpush1.msra.mxu1 %v44_v30  ;;  %v69_v43 = vld [vmem:[#allocation5 + $0xd8] sm:$0xff]  ;;  %v54_v45 = vld [vmem:[#allocation5 + $0x60] sm:$0xff]  ;;  %v47_v48 = vld [vmem:[#allocation5 + $0x28] sm:$0xff] }
  0x2d   :  { %461 = vmatmul.mubr.msk.f32.vlgmr.msra.gmra.mxu0 %vm91_vm1, %v612_v28  ;;  %467 = vmatprep.subr.msk.mxu0 %vm98_vm0, %v89_v29  ;;  %v62_v46 = vld [vmem:[#allocation5 + $0xa0] sm:$0xff]  ;;  %v53_v47 = vld [vmem:[#allocation5 + $0x58] sm:$0xff]  ;;  %v55_v49 = vld [vmem:[#allocation5 + $0x68] sm:$0xff] }
  0x2e   :  { %468 = vmatpush1.msk.msra.mxu0 %vm98_vm0, %v88_v31  ;;  %483 = vmatprep.subr.msk.mxu1 %vm98_vm0, %v90_v33  ;;  %v46_v50 = vld [vmem:[#allocation5 + $0x20] sm:$0xff]  ;;  %v48_v51 = vld [vmem:[#allocation5 + $0x30] sm:$0xff] }
  0x2f   :  { %294 = vmatprep.subr.mxu0 %v82_v32  ;;  %465 = vmatmul.mubr.msk.f32.vlgmr.msra.gmra.mxu1 %vm91_vm1, %v612_v28 }
  0x30   :  { %295 = vmatpush1.msra.mxu0 %v81_v34  ;;  %484 = vmatpush3.msk.msra.mxu1 %vm98_vm0, %v90_v33 }
  0x31   :  { %296 = vmatprep.subr.mxu0 %v75_v35  ;;  %485 = vmatprep.subr.mxu1 %v83_v36 }
  0x32   :  { %297 = vmatpush1.msra.mxu0 %v74_v37  ;;  %486 = vmatpush3.msra.mxu1 %v83_v36 }
  0x33   :  { %298 = vmatprep.subr.mxu0 %v68_v38  ;;  %487 = vmatprep.subr.mxu1 %v76_v39 }
  0x34   :  { %190 = vmatprep.mubr.f32.mxu0 %v580_v0  ;;  %299 = vmatpush1.msra.mxu0 %v67_v40 }
  0x35   :  { %488 = vmatpush3.msra.mxu1 %v76_v39  ;;  %462 = vmatmul.mubr.msk.f32.gmra.mxu0 %vm91_vm1, %v41_v41 }
  0x36   :  { %300 = vmatprep.subr.mxu0 %v61_v42  ;;  %489 = vmatprep.subr.mxu1 %v69_v43 }
  0x37   :  { %301 = vmatpush1.msra.mxu0 %v60_v44  ;;  %490 = vmatpush3.msra.mxu1 %v69_v43 }
  0x38   :  { %302 = vmatprep.subr.mxu0 %v54_v45  ;;  %491 = vmatprep.subr.mxu1 %v62_v46 }
  0x39   :  { %267 = vmatprep.mubr.f32.mxu1 %v580_v0  ;;  %303 = vmatpush1.msra.mxu0 %v53_v47 }
  0x3a   :  { %492 = vmatpush3.msra.mxu1 %v62_v46  ;;  %304 = vmatprep.subr.mxu0 %v47_v48 }
  0x3b   :  { %466 = vmatmul.mubr.msk.f32.gmra.mxu1 %vm91_vm1, %v41_v41  ;;  %493 = vmatprep.subr.mxu1 %v55_v49 }
  0x3c   :  { %305 = vmatpush1.msra.mxu0 %v46_v50  ;;  %338 = vmatprep.mubr.f32.mxu0 %v580_v0 }
  0x3d   :  { %494 = vmatpush3.msra.mxu1 %v55_v49  ;;  %469 = vmatmul.mubr.msk.f32.vlgmr.msra.gmra.mxu0 %vm91_vm1, %v612_v28 }
  0x3e   :  { %495 = vmatprep.subr.mxu1 %v48_v51  ;;  %497 = vmatprep.mubr.msk.f32.mxu1 %vm91_vm1, %v612_v28 }
  0x3f   :  { %496 = vmatpush3.msra.mxu1 %v48_v51  ;;  %344 = vmatprep.mubr.f32.mxu0 %v580_v0 }
  0x40   :  { %498 = vmatmul.mubr.msk.f32.vlgmr.msra.gmra.mxu1 %vm91_vm1, %v41_v41 }
  0x41   :  { %470 = vmatmul.mubr.msk.f32.gmra.mxu0 %vm91_vm1, %v41_v41 }
  0xed   :  { %v186_v52 = vpop.f32.mrf.mxu0 }
  0xee   :  { %426 = vst [vmem:[#allocation7] sm:$0xff] %v186_v52 }
  0xef   :  { %v188_v53 = vpop.f32.mrf.mxu0  ;;  %v263_v54 = vpop.f32.mrf.mxu1 }
  0xf0   :  { %427 = vst [vmem:[#allocation7 + $0x8] sm:$0xff] %v188_v53  ;;  %428 = vst [vmem:[#allocation7 + $0x10] sm:$0xff] %v263_v54 }
  0xf1   :  { %v265_v55 = vpop.f32.mrf.mxu1 }
  0xf2   :  { %429 = vst [vmem:[#allocation7 + $0x18] sm:$0xff] %v265_v55 }
  0xf5   :  { %v192_v56 = vpop.f32.mrf.mxu0 }
  0xf6   :  { %434 = vst [vmem:[#allocation7 + $0x38] sm:$0xff] %v192_v56 }
  0xf7   :  { %v194_v57 = vpop.f32.mrf.mxu0 }
  0xf8   :  { %435 = vst [vmem:[#allocation7 + $0x40] sm:$0xff] %v194_v57 }
  0xfb   :  { %v269_v58 = vpop.f32.mrf.mxu1 }
  0xfc   :  { %436 = vst [vmem:[#allocation7 + $0x48] sm:$0xff] %v269_v58 }
  0xfd   :  { %v271_v59 = vpop.f32.mrf.mxu1  ;;  %v340_v60 = vpop.f32.mrf.mxu0 }
  0xfe   :  { %437 = vst [vmem:[#allocation7 + $0x50] sm:$0xff] %v271_v59  ;;  %430 = vst [vmem:[#allocation7 + $0x20] sm:$0xff] %v340_v60 }
  0xff   :  { %v342_v61 = vpop.f32.mrf.mxu0 }
 0x100   :  { %v499_v62 = vpop.f32.mrf.mxu1  ;;  %431 = vst [vmem:[#allocation7 + $0x28] sm:$0xff] %v342_v61 }
 0x101   :  { %440 = vst.msk [vmem:[#allocation7 + $0x68] sm:$0xff] %vm432_vm2, %v499_v62  ;;  %v346_v63 = vpop.f32.mrf.mxu0 }
 0x102   :  { %v417_v0 = vpop.f32.mrf.mxu1  ;;  %438 = vst [vmem:[#allocation7 + $0x58] sm:$0xff] %v346_v63 }
 0x103   :  { %433 = vst.msk [vmem:[#allocation7 + $0x30] sm:$0xff] %vm432_vm2, %v417_v0  ;;  %v348_v1 = vpop.f32.mrf.mxu0 }
 0x104   :  { %439 = vst [vmem:[#allocation7 + $0x60] sm:$0xff] %v348_v1 }
 0x105   :  { %559 = shalt.err (!%p556_p0)
}
 0x106   :  { %452 = dma.vmem_to_hbm [thread:$0]  %s447_s1, 1792, %s642_s2, [#allocation4], %s578_s19, %s578_s19, %s579_s20  }
 0x107   :  { %572 = dma.done.wait [#allocation4], 1792  }
 0x108   :  { %573 = vsyncadd [#allocation4], 4294965504 }
 0x109   :  { %456 = vsyncpa [#allocation3], 1 }
 0x10a   :  { %457 = vsyncpa [#allocation6], 1 }
 0x10b   :  { %458 = vsyncpa [#allocation4], 1 }

</bundles_post_ra>
